<compile_context>
chip_gen: v7x
topology: tpu7x:2x2x1
jax: 0.10.0
libtpu: 0.0.40
codegen_flags: <defaults>
</compile_context>

<pallas_src>
import jax
import jax.numpy as jnp
from jax.experimental import pallas as pl
from jax.experimental.pallas import tpu as pltpu


def value_net_kernel(xT_ref, w1_ref, b1_ref, w2_ref, b2_ref, out_ref):
    # xT_ref : (state_dim, TILE_B)   batch on lanes
    # w1_ref : (hidden, state_dim)   PyTorch fc1.weight layout
    # b1_ref : (hidden, 1)
    # w2_ref : (hidden, 1)           fc2.weight^T
    # b2_ref : (1, 1) in SMEM
    # out_ref: (1, TILE_B)           lane-dense value row
    state_dim = w1_ref.shape[1]
    xT = xT_ref[...]
    w1 = w1_ref[...]

    # fc1 on the VPU: state_dim (=3) rank-1 broadcast multiply-adds. No MXU.
    hT = b1_ref[...] + w1[:, 0:1] * xT[0:1, :]           # (hidden, TILE_B)
    for k in range(1, state_dim):                         # tiny static unroll
        hT = hT + w1[:, k:k + 1] * xT[k:k + 1, :]
    hT = jnp.maximum(hT, 0.0)                             # ReLU

    # fc2 (single output unit): multiply + cross-sublane reduction instead of
    # a (TILE_B,128)@(128,1) matmul that would use a single MXU column.
    v = jnp.sum(hT * w2_ref[...], axis=0, keepdims=True)  # (1, TILE_B)
    out_ref[...] = v + b2_ref[0, 0]                        # scalar bias from SMEM


@jax.jit
def value_net_forward(x, w1, b1, w2, b2):
    """Forward pass matching torch ValueNet.

    x : (B, state_dim)
    Params in PyTorch nn.Linear layout:
      w1 (hidden, state_dim), b1 (hidden,), w2 (1, hidden), b2 (1,)
    Returns (B, 1) float32.
    """
    B, state_dim = x.shape
    hidden = w1.shape[0]

    # Lanes per grid step: whole batch rounded up to 128 for small minibatches
    # (B=200 -> one 256-lane step, no second step), capped at 512 so
    # hT = (hidden, tile_b) stays near the vreg-file budget and large batches
    # still expose >=2 substantial "parallel" steps for v7x's two TensorCores.
    tile_b = min(512, 128 * pl.cdiv(B, 128))
    num_tiles = pl.cdiv(B, tile_b)

    # One-time, tiny layout plumbing: batch on lanes. No zero-pad / scatter —
    # Pallas masks the ragged last lane block itself.
    xT = x.T.astype(jnp.float32)                        # (state_dim, B)
    w1c = w1.astype(jnp.float32)                        # (hidden, state_dim)
    b1c = b1.reshape(hidden, 1).astype(jnp.float32)
    w2c = w2.reshape(hidden, 1).astype(jnp.float32)     # == fc2.weight^T
    b2s = b2.reshape(1, 1).astype(jnp.float32)          # scalar -> SMEM

    out_t = pl.pallas_call(
        value_net_kernel,
        out_shape=jax.ShapeDtypeStruct((1, B), jnp.float32),
        grid=(num_tiles,),
        in_specs=[
            pl.BlockSpec((state_dim, tile_b), lambda i: (0, i)),   # x^T tile
            pl.BlockSpec((hidden, state_dim), lambda i: (0, 0)),   # w1 (resident)
            pl.BlockSpec((hidden, 1), lambda i: (0, 0)),           # b1 (resident)
            pl.BlockSpec((hidden, 1), lambda i: (0, 0)),           # w2 (resident)
            pl.BlockSpec(memory_space=pltpu.MemorySpace.SMEM),     # b2 scalar
        ],
        out_specs=pl.BlockSpec((1, tile_b), lambda i: (0, i)),
        compiler_params=pltpu.CompilerParams(
            dimension_semantics=("parallel",)),
    )(xT, w1c, b1c, w2c, b2s)

    return out_t.T                                      # (B, 1); free reshape


def init_params(key, state_dim, hidden_dim):
    # Deterministic init mimicking torch.nn.Linear (uniform +-1/sqrt(fan_in)),
    # stored in PyTorch layout: weight (out_features, in_features).
    k1, k2, k3, k4 = jax.random.split(key, 4)
    bound1 = 1.0 / (state_dim ** 0.5)
    bound2 = 1.0 / (hidden_dim ** 0.5)
    w1 = jax.random.uniform(k1, (hidden_dim, state_dim), jnp.float32,
                            -bound1, bound1)
    b1 = jax.random.uniform(k2, (hidden_dim,), jnp.float32, -bound1, bound1)
    w2 = jax.random.uniform(k3, (1, hidden_dim), jnp.float32, -bound2, bound2)
    b2 = jax.random.uniform(k4, (1,), jnp.float32, -bound2, bound2)
    return w1, b1, w2, b2


if __name__ == "__main__":
    state_dim = 3      # Pendulum-v0 observation space
    hidden_dim = 128
    batch = 200        # PPO minibatch; deliberately not a multiple of 128

    key = jax.random.PRNGKey(0)
    kx, kp = jax.random.split(key)
    x = jax.random.normal(kx, (batch, state_dim), jnp.float32)
    w1, b1, w2, b2 = init_params(kp, state_dim, hidden_dim)

    out = jax.block_until_ready(value_net_forward(x, w1, b1, w2, b2))

    # Pure-JAX reference with PyTorch Linear semantics.
    ref = jnp.maximum(x @ w1.T + b1, 0.0) @ w2.T + b2
    assert out.shape == (batch, 1)
    assert jnp.allclose(out, ref, atol=1e-5, rtol=1e-5), \
        float(jnp.max(jnp.abs(out - ref)))

    print("KERNEL_OK")
</pallas_src>

<mosaic_0001>
module attributes {stable_mosaic.version = 11 : i64} {
  func.func @value_net_kernel(%arg0: i32, %arg1: memref<3x256xf32, #tpu.memory_space<vmem>>, %arg2: memref<128x3xf32, #tpu.memory_space<vmem>>, %arg3: memref<128x1xf32, #tpu.memory_space<vmem>>, %arg4: memref<128x1xf32, #tpu.memory_space<vmem>>, %arg5: memref<1x1xf32, #tpu.memory_space<smem>>, %arg6: memref<1x256xf32, #tpu.memory_space<vmem>>) attributes {dimension_semantics = [#tpu.dimension_semantics<parallel>], iteration_bounds = array<i64: 1>, scalar_prefetch = 0 : i64, scratch_operands = 0 : i64, tpu.core_type = #tpu.core_type<tc>, window_params = [{transform_indices = @transform_0, window_bounds = array<i64: 3, 256>}, {pipeline_mode = #tpu.pipeline_mode<synchronous>, transform_indices = @transform_1, window_bounds = array<i64: 128, 3>}, {pipeline_mode = #tpu.pipeline_mode<synchronous>, transform_indices = @transform_2, window_bounds = array<i64: 128, 1>}, {pipeline_mode = #tpu.pipeline_mode<synchronous>, transform_indices = @transform_3, window_bounds = array<i64: 128, 1>}, {transform_indices = @transform_4, window_bounds = array<i64: 1, 1>}, {transform_indices = @transform_5, window_bounds = array<i64: 1, 256>}]} {
    %c0 = arith.constant 0 : index
    %c0_0 = arith.constant 0 : index
    %0 = vector.load %arg1[%c0, %c0_0] : memref<3x256xf32, #tpu.memory_space<vmem>>, vector<3x256xf32>
    %c0_1 = arith.constant 0 : index
    %c0_2 = arith.constant 0 : index
    %1 = vector.load %arg2[%c0_1, %c0_2] : memref<128x3xf32, #tpu.memory_space<vmem>>, vector<128x3xf32>
    %c0_3 = arith.constant 0 : index
    %c0_4 = arith.constant 0 : index
    %2 = vector.load %arg3[%c0_3, %c0_4] : memref<128x1xf32, #tpu.memory_space<vmem>>, vector<128x1xf32>
    %3 = vector.extract_strided_slice %1 {offsets = [0, 0], sizes = [128, 1], strides = [1, 1]} : vector<128x3xf32> to vector<128x1xf32>
    %4 = vector.extract_strided_slice %0 {offsets = [0, 0], sizes = [1, 256], strides = [1, 1]} : vector<3x256xf32> to vector<1x256xf32>
    %5 = vector.broadcast %3 : vector<128x1xf32> to vector<128x256xf32>
    %6 = vector.broadcast %4 : vector<1x256xf32> to vector<128x256xf32>
    %7 = arith.mulf %5, %6 : vector<128x256xf32>
    %8 = vector.broadcast %2 : vector<128x1xf32> to vector<128x256xf32>
    %9 = arith.addf %8, %7 : vector<128x256xf32>
    %10 = vector.extract_strided_slice %1 {offsets = [0, 1], sizes = [128, 1], strides = [1, 1]} : vector<128x3xf32> to vector<128x1xf32>
    %11 = vector.extract_strided_slice %0 {offsets = [1, 0], sizes = [1, 256], strides = [1, 1]} : vector<3x256xf32> to vector<1x256xf32>
    %12 = vector.broadcast %10 : vector<128x1xf32> to vector<128x256xf32>
    %13 = vector.broadcast %11 : vector<1x256xf32> to vector<128x256xf32>
    %14 = arith.mulf %12, %13 : vector<128x256xf32>
    %15 = arith.addf %9, %14 : vector<128x256xf32>
    %16 = vector.extract_strided_slice %1 {offsets = [0, 2], sizes = [128, 1], strides = [1, 1]} : vector<128x3xf32> to vector<128x1xf32>
    %17 = vector.extract_strided_slice %0 {offsets = [2, 0], sizes = [1, 256], strides = [1, 1]} : vector<3x256xf32> to vector<1x256xf32>
    %18 = vector.broadcast %16 : vector<128x1xf32> to vector<128x256xf32>
    %19 = vector.broadcast %17 : vector<1x256xf32> to vector<128x256xf32>
    %20 = arith.mulf %18, %19 : vector<128x256xf32>
    %21 = arith.addf %15, %20 : vector<128x256xf32>
    %cst = arith.constant 0.000000e+00 : f32
    %22 = vector.broadcast %cst : f32 to vector<128x256xf32>
    %23 = arith.maximumf %21, %22 : vector<128x256xf32>
    %c0_5 = arith.constant 0 : index
    %c0_6 = arith.constant 0 : index
    %24 = vector.load %arg4[%c0_5, %c0_6] : memref<128x1xf32, #tpu.memory_space<vmem>>, vector<128x1xf32>
    %25 = vector.broadcast %24 : vector<128x1xf32> to vector<128x256xf32>
    %26 = arith.mulf %23, %25 : vector<128x256xf32>
    %cst_7 = arith.constant dense<0.000000e+00> : vector<256xf32>
    %27 = vector.multi_reduction <add>, %26, %cst_7 [0] : vector<128x256xf32> to vector<256xf32>
    %28 = vector.shape_cast %27 : vector<256xf32> to vector<1x256xf32>
    %c0_8 = arith.constant 0 : index
    %c0_9 = arith.constant 0 : index
    %29 = memref.load %arg5[%c0_8, %c0_9] : memref<1x1xf32, #tpu.memory_space<smem>>
    %30 = vector.broadcast %29 : f32 to vector<1x256xf32>
    %31 = arith.addf %28, %30 : vector<1x256xf32>
    %c0_10 = arith.constant 0 : index
    %c0_11 = arith.constant 0 : index
    %32 = vector.load %arg6[%c0_10, %c0_11] : memref<1x256xf32, #tpu.memory_space<vmem>>, vector<1x256xf32>
    tpu.vector_store %arg6[%c0_10, %c0_11], %31 {strides = array<i32>} : memref<1x256xf32, #tpu.memory_space<vmem>>, vector<1x256xf32>,
    return
  }
  func.func @transform_0(%arg0: i32) -> (i32, i32) {
    %c0_i32 = arith.constant 0 : i32
    %c0_i32_0 = arith.constant 0 : i32
    return %c0_i32, %arg0 : i32, i32
  }
  func.func @transform_1(%arg0: i32) -> (i32, i32) {
    %c0_i32 = arith.constant 0 : i32
    %c0_i32_0 = arith.constant 0 : i32
    %c0_i32_1 = arith.constant 0 : i32
    return %c0_i32, %c0_i32_0 : i32, i32
  }
  func.func @transform_2(%arg0: i32) -> (i32, i32) {
    %c0_i32 = arith.constant 0 : i32
    %c0_i32_0 = arith.constant 0 : i32
    %c0_i32_1 = arith.constant 0 : i32
    return %c0_i32, %c0_i32_0 : i32, i32
  }
  func.func @transform_3(%arg0: i32) -> (i32, i32) {
    %c0_i32 = arith.constant 0 : i32
    %c0_i32_0 = arith.constant 0 : i32
    %c0_i32_1 = arith.constant 0 : i32
    return %c0_i32, %c0_i32_0 : i32, i32
  }
  func.func @transform_4(%arg0: i32) -> (i32, i32) {
    %c0_i32 = arith.constant 0 : i32
    %c0_i32_0 = arith.constant 0 : i32
    %c0_i32_1 = arith.constant 0 : i32
    return %c0_i32, %c0_i32_0 : i32, i32
  }
  func.func @transform_5(%arg0: i32) -> (i32, i32) {
    %c0_i32 = arith.constant 0 : i32
    %c0_i32_0 = arith.constant 0 : i32
    return %c0_i32, %arg0 : i32, i32
  }
}

</mosaic_0001>

<bundles_post_ra>
// kernel: value_net_forward.1
= control target key start
LH: loop header
LB: loop body
LE: loop exit
PB: predicated region body
PF: predicated region fallthrough
CT: control target
= control target key end

     0   :  { %v879_v2 = vmov 1   ;;  %v880_v3 = vmov 0   ;;  %s1450_s0 = inlined_call_operand.vmem [shape: f32[3,200], index: 0, kind: input, shape index: {}]   ;;  %s1451_s1 = inlined_call_operand.vmem [shape: f32[128,3], index: 1, kind: input, shape index: {}]   ;;  %s1452_s2 = inlined_call_operand.vmem [shape: f32[128,1], index: 2, kind: input, shape index: {}]   ;;  %s1453_s3 = inlined_call_operand.vmem [shape: f32[128,1], index: 3, kind: input, shape index: {}]   ;;  %s1454_s4 = inlined_call_operand.<no memory space> [shape: f32[1,1], index: 4, kind: input, shape index: {}]   ;;  %s1455_s5 = inlined_call_operand.hbm [shape: f32[1,200], index: 5, kind: output, shape index: {}]  }
   0x1   :  { %v917_v0 = vld [vmem:[%s1451_s1 + $0x10] sm:$0xff]  ;;  %v922_v1 = vld [vmem:[%s1451_s1] sm:$0xff]  ;;  %839 = vset.pattern.permute.xlu0 %v879_v2  ;;  %838 = vset.pattern.permute.xlu1 %v880_v3  ;;  %v930_v4 = vld [vmem:[%s1451_s1 + $0x18] sm:$0xff] }
   0x2   :  { %67 = vperm.xlu1 %838, %v917_v0   ;;  %299 = vperm.xlu0 %839, %v922_v1   ;;  %v937_v5 = vld [vmem:[%s1451_s1 + $0x28] sm:$0xff]  ;;  %v944_v6 = vld [vmem:[%s1451_s1 + $0x38] sm:$0xff] }
   0x6   :  { %72 = vperm.xlu1 %838, %v930_v4   ;;  %311 = vperm.xlu0 %839, %v930_v4  }
   0xa   :  { %82 = vperm.xlu1 %838, %v937_v5   ;;  %319 = vperm.xlu0 %839, %v937_v5  }
   0xb   :  { %11 = vsyncpa [#allocation4], 0  ;;  %v951_v7 = vld [vmem:[%s1451_s1 + $0x48] sm:$0xff]  ;;  %v958_v8 = vld [vmem:[%s1451_s1 + $0x58] sm:$0xff]  ;;  %v881_v13 = vmov 2   ;;  %v136_v55 = vlaneseq  ;;  %s883_s12 = smov [#allocation3]  }
   0xc   :  { %v965_v9 = vld [vmem:[%s1451_s1 + $0x68] sm:$0xff]  ;;  %v972_v10 = vld [vmem:[%s1451_s1 + $0x78] sm:$0xff]  ;;  %v27_v15 = vld [vmem:[%s1451_s1 + $0x20] sm:$0xff]  ;;  %s825_s13 = sshll.u32 %s883_s12, 4  ;;  %s826_s13 = int_to_ptr.vmem [resolvable:$true] %s825_s13 }
   0xd   :  { %v40_v11 = vld [vmem:[%s1452_s2 + $0x8] sm:$0xff]  ;;  %v42_v14 = vld [vmem:[%s1452_s2 + $0x18] sm:$0xff]  ;;  %v29_v17 = vld [vmem:[%s1451_s1 + $0x30] sm:$0xff]  ;;  %v1123_v58 = vshrl.u32 %v136_v55, 7  ;;  %vm816_vm0 = vcmp.lt.s32.totalorder %v136_v55, 256  ;;  %s855_s14 = scalar_lea.vmem %s826_s13, 32  ;;  %p860_p1 = scmp.lt.s32.totalorder %s826_s13, %s826_s13 }
   0xe   :  { %92 = vperm.xlu1 %838, %v944_v6   ;;  %327 = vperm.xlu0 %839, %v944_v6   ;;  %v24_v12 = vld [vmem:[%s1451_s1 + $0x8] sm:$0xff]  ;;  %v46_v18 = vld [vmem:[%s1452_s2 + $0x38] sm:$0xff]  ;;  %v1015_v23 = vld [vmem:[%s1451_s1 + $0x40] sm:$0xff]  ;;  %p856_p0 = scmp.ne.s32.totalorder %s826_s13, %s855_s14  ;;  %p861_p2 = scmp.lt.s32.totalorder %s855_s14, %s855_s14 }
   0xf   :  { %v44_v16 = vld [vmem:[%s1452_s2 + $0x28] sm:$0xff]  ;;  %v50_v20 = vld [vmem:[%s1452_s2 + $0x58] sm:$0xff]  ;;  %v1021_v24 = vld [vmem:[%s1451_s1 + $0x50] sm:$0xff]  ;;  %v364_v59 = vsub.s32 1, %v1123_v58  ;;  %v368_v60 = vsub.s32 5, %v1123_v58  ;;  %v138_v63 = vsub.s32 0, %v1123_v58 }
  0x10   :  { %v48_v19 = vld [vmem:[%s1452_s2 + $0x48] sm:$0xff]  ;;  %v54_v22 = vld [vmem:[%s1452_s2 + $0x78] sm:$0xff]  ;;  %v35_v25 = vld [vmem:[%s1451_s1 + $0x60] sm:$0xff]  ;;  %p862_p3 = por %p861_p2, %p860_p1 }
  0x11   :  { %v52_v21 = vld [vmem:[%s1452_s2 + $0x68] sm:$0xff]  ;;  %v1031_v26 = vld [vmem:[%s1451_s1 + $0x70] sm:$0xff]  ;;  %v39_v27 = vld [vmem:[%s1452_s2] sm:$0xff] }
  0x12   :  { %102 = vperm.xlu1 %838, %v951_v7   ;;  %335 = vperm.xlu0 %839, %v951_v7   ;;  %v41_v28 = vld [vmem:[%s1452_s2 + $0x10] sm:$0xff]  ;;  %v43_v29 = vld [vmem:[%s1452_s2 + $0x20] sm:$0xff]  ;;  %v623_v35 = vld [vmem:[%s1453_s3 + $0x8] sm:$0xff]  ;;  %p863_p4 = pnand %p862_p3, %p856_p0 }
  0x13   :  { %v45_v30 = vld [vmem:[%s1452_s2 + $0x30] sm:$0xff]  ;;  %v47_v31 = vld [vmem:[%s1452_s2 + $0x40] sm:$0xff]  ;;  %v629_v38 = vld [vmem:[%s1453_s3 + $0x38] sm:$0xff] }
  0x14   :  { %v49_v32 = vld [vmem:[%s1452_s2 + $0x50] sm:$0xff]  ;;  %v51_v33 = vld [vmem:[%s1452_s2 + $0x60] sm:$0xff]  ;;  %v625_v41 = vld [vmem:[%s1453_s3 + $0x18] sm:$0xff] }
  0x15   :  { %v53_v34 = vld [vmem:[%s1452_s2 + $0x70] sm:$0xff]  ;;  %v622_v36 = vld [vmem:[%s1453_s3] sm:$0xff]  ;;  %v627_v48 = vld [vmem:[%s1453_s3 + $0x28] sm:$0xff] }
  0x16   :  { %112 = vperm.xlu1 %838, %v958_v8   ;;  %343 = vperm.xlu0 %839, %v958_v8   ;;  %v626_v37 = vld [vmem:[%s1453_s3 + $0x20] sm:$0xff]  ;;  %v624_v39 = vld [vmem:[%s1453_s3 + $0x10] sm:$0xff] }
  0x17   :  { %v632_v40 = vld [vmem:[%s1453_s3 + $0x50] sm:$0xff] }
  0x18   :  { %v636_v49 = vld [vmem:[%s1453_s3 + $0x70] sm:$0xff] }
  0x19   :  { %v628_v52 = vld [vmem:[%s1453_s3 + $0x30] sm:$0xff] }
  0x1a   :  { %122 = vperm.xlu1 %838, %v965_v9   ;;  %351 = vperm.xlu0 %839, %v965_v9  }
  0x1e   :  { %132 = vperm.xlu1 %838, %v972_v10   ;;  %359 = vperm.xlu0 %839, %v972_v10  }
  0x22   :  { %193 = vperm.xlu1 %838, %v40_v11   ;;  %842 = vset.pattern.permute.xlu0 %v881_v13 }
  0x23   :  { %449 = vperm.xlu0 %842, %v24_v12  }
  0x26   :  { %203 = vperm.xlu1 %838, %v42_v14   ;;  %v631_v14 = vld [vmem:[%s1453_s3 + $0x48] sm:$0xff] }
  0x27   :  { %461 = vperm.xlu0 %842, %v27_v15  }
  0x2a   :  { %213 = vperm.xlu1 %838, %v44_v16  }
  0x2b   :  { %469 = vperm.xlu0 %842, %v29_v17  }
  0x2e   :  { %223 = vperm.xlu1 %838, %v46_v18  }
  0x2f   :  { %846 = vset.pattern.permute.xlu0 %v880_v3 }
  0x30   :  { %57 = vperm.xlu0 %846, %v922_v1  }
  0x32   :  { %233 = vperm.xlu1 %838, %v48_v19  }
  0x34   :  { %62 = vperm.xlu0 %846, %v24_v12  }
  0x36   :  { %243 = vperm.xlu1 %838, %v50_v20  }
  0x38   :  { %77 = vperm.xlu0 %846, %v27_v15  }
  0x3a   :  { %253 = vperm.xlu1 %838, %v52_v21  }
  0x3c   :  { %87 = vperm.xlu0 %846, %v29_v17  }
  0x3e   :  { %263 = vperm.xlu1 %838, %v54_v22  }
  0x40   :  { %97 = vperm.xlu0 %846, %v1015_v23  }
  0x42   :  { %840 = vset.pattern.permute.xlu1 %v879_v2 }
  0x43   :  { %303 = vperm.xlu1 %840, %v24_v12  }
  0x44   :  { %107 = vperm.xlu0 %846, %v1021_v24  }
  0x47   :  { %307 = vperm.xlu1 %840, %v917_v0  }
  0x48   :  { %117 = vperm.xlu0 %846, %v35_v25  }
  0x4b   :  { %315 = vperm.xlu1 %840, %v27_v15  }
  0x4c   :  { %127 = vperm.xlu0 %846, %v1031_v26  }
  0x4f   :  { %323 = vperm.xlu1 %840, %v29_v17  }
  0x50   :  { %188 = vperm.xlu0 %846, %v39_v27  }
  0x53   :  { %331 = vperm.xlu1 %840, %v1015_v23  }
  0x54   :  { %198 = vperm.xlu0 %846, %v41_v28  }
  0x57   :  { %339 = vperm.xlu1 %840, %v1021_v24  }
  0x58   :  { %208 = vperm.xlu0 %846, %v43_v29  }
  0x5b   :  { %347 = vperm.xlu1 %840, %v35_v25  }
  0x5c   :  { %218 = vperm.xlu0 %846, %v45_v30  }
  0x5f   :  { %355 = vperm.xlu1 %840, %v1031_v26  }
  0x60   :  { %228 = vperm.xlu0 %846, %v47_v31  }
  0x63   :  { %841 = vset.pattern.permute.xlu1 %v881_v13 }
  0x64   :  { %445 = vperm.xlu1 %841, %v922_v1   ;;  %238 = vperm.xlu0 %846, %v49_v32   ;;  %v1138_v1 = vld [vmem:[%s1450_s0] sm:$0x77] }
  0x65   :  { %v365_v2 = vrot.slane %v1138_v1, %v364_v59 }
  0x67   :  { %v1152_v11 = vrot.slane %v365_v2, %v364_v59 }
  0x68   :  { %453 = vperm.xlu1 %841, %v917_v0   ;;  %248 = vperm.xlu0 %846, %v51_v33   ;;  %v142_v0 = vsub.s32 4, %v1123_v58 }
  0x6c   :  { %457 = vperm.xlu1 %841, %v930_v4   ;;  %258 = vperm.xlu0 %846, %v53_v34   ;;  %v369_v4 = vrot.slane %v1138_v1, %v368_v60 }
  0x6e   :  { %v1154_v12 = vrot.slane %v369_v4, %v364_v59 }
  0x70   :  { %843 = vset.pattern.permute.xlu1 %v880_v3  ;;  %645 = vperm.xlu0 %846, %v623_v35  }
  0x71   :  { %640 = vperm.xlu1 %843, %v622_v36  }
  0x74   :  { %660 = vperm.xlu0 %846, %v626_v37  }
  0x75   :  { %844 = vset.pattern.permute.xlu1 %v881_v13 }
  0x76   :  { %465 = vperm.xlu1 %844, %v937_v5   ;;  %v630_v5 = vld [vmem:[%s1453_s3 + $0x40] sm:$0xff] }
  0x78   :  { %675 = vperm.xlu0 %846, %v629_v38  }
  0x7a   :  { %845 = vset.pattern.permute.xlu1 %v880_v3 }
  0x7b   :  { %650 = vperm.xlu1 %845, %v624_v39  }
  0x7c   :  { %690 = vperm.xlu0 %846, %v632_v40  }
  0x7f   :  { %655 = vperm.xlu1 %845, %v625_v41  }
  0x80   :  { %852 = vset.pattern.permute.xlu0 %v881_v13 }
  0x81   :  { %v1091_v42 = vpop.permute.xlu1 %67  ;;  %481 = vperm.xlu0 %852, %v951_v7   ;;  %v1094_v43 = vpop.permute.xlu0 %299 }
  0x83   :  { %847 = vset.pattern.permute.xlu1 %v881_v13 }
  0x84   :  { %473 = vperm.xlu1 %847, %v944_v6  }
  0x85   :  { %v73_v44 = vpop.permute.xlu1 %72  ;;  %493 = vperm.xlu0 %852, %v35_v25   ;;  %v312_v45 = vpop.permute.xlu0 %311 }
  0x86   :  { %v386_v21 = vmul.f32 %v1152_v11, %v312_v45  ;;  %v387_v22 = vmul.f32 %v1154_v12, %v312_v45 }
  0x88   :  { %477 = vperm.xlu1 %847, %v1015_v23  }
  0x89   :  { %v83_v46 = vpop.permute.xlu1 %82  ;;  %505 = vperm.xlu0 %852, %v972_v10   ;;  %v320_v47 = vpop.permute.xlu0 %319  ;;  %v139_v10 = vrot.slane %v1138_v1, %v138_v63 }
  0x8a   :  { %v390_v30 = vmul.f32 %v1152_v11, %v320_v47  ;;  %v391_v31 = vmul.f32 %v1154_v12, %v320_v47  ;;  %v633_v47 = vld [vmem:[%s1453_s3 + $0x58] sm:$0xff] }
  0x8b   :  { %v1161_v16 = vrot.slane %v139_v10, %v138_v63 }
  0x8c   :  { %848 = vset.pattern.permute.xlu1 %v880_v3 }
  0x8d   :  { %v93_v50 = vpop.permute.xlu1 %92  ;;  %665 = vperm.xlu1 %848, %v627_v48   ;;  %v1107_v51 = vpop.permute.xlu0 %327  ;;  %854 = vset.pattern.permute.xlu0 %v880_v3  ;;  %v160_v19 = vmul.f32 %v1161_v16, %v73_v44  ;;  %v164_v28 = vmul.f32 %v1161_v16, %v83_v46 }
  0x8e   :  { %710 = vperm.xlu0 %854, %v636_v49   ;;  %v168_v38 = vmul.f32 %v1161_v16, %v93_v50 }
  0x91   :  { %v1113_v53 = vpop.permute.xlu1 %102  ;;  %670 = vperm.xlu1 %848, %v628_v52   ;;  %v1115_v54 = vpop.permute.xlu0 %335 }
  0x92   :  { %v172_v49 = vmul.f32 %v1161_v16, %v1113_v53  ;;  %v398_v59 = vmul.f32 %v1152_v11, %v1115_v54  ;;  %v399_v60 = vmul.f32 %v1154_v12, %v1115_v54  ;;  %v514_v54 = vsub.s32 6, %v1123_v58 }
  0x95   :  { %v1117_v56 = vpop.permute.xlu1 %112  ;;  %849 = vset.pattern.permute.xlu1 %v881_v13  ;;  %v1120_v57 = vpop.permute.xlu0 %343 }
  0x96   :  { %485 = vperm.xlu1 %849, %v1021_v24   ;;  %v176_v4 = vmul.f32 %v1161_v16, %v1117_v56 }
  0x99   :  { %v1128_v61 = vpop.permute.xlu1 %122  ;;  %v1130_v62 = vpop.permute.xlu0 %351 }
  0x9a   :  { %489 = vperm.xlu1 %849, %v958_v8   ;;  %v143_v8 = vrot.slane %v1138_v1, %v142_v0 }
  0x9c   :  { %v1163_v17 = vrot.slane %v143_v8, %v138_v63  ;;  %v510_v8 = vsub.s32 2, %v1123_v58 }
  0x9d   :  { %v1145_v6 = vpop.permute.xlu1 %132  ;;  %v1147_v7 = vpop.permute.xlu0 %359 }
  0x9e   :  { %850 = vset.pattern.permute.xlu1 %v880_v3  ;;  %v161_v20 = vmul.f32 %v1163_v17, %v73_v44  ;;  %v165_v29 = vmul.f32 %v1163_v17, %v83_v46  ;;  %v169_v39 = vmul.f32 %v1163_v17, %v93_v50  ;;  %v394_v44 = vmul.f32 %v1152_v11, %v1107_v51 }
  0x9f   :  { %680 = vperm.xlu1 %850, %v630_v5  }
  0xa1   :  { %v1159_v15 = vpop.permute.xlu1 %193 }
  0xa2   :  { %v1165_v18 = vpop.permute.xlu0 %449 }
  0xa3   :  { %685 = vperm.xlu1 %850, %v631_v14  }
  0xa5   :  { %v204_v23 = vpop.permute.xlu1 %203 }
  0xa6   :  { %v272_v24 = vadd.f32 %v204_v23, %v160_v19  ;;  %v273_v25 = vadd.f32 %v204_v23, %v161_v20  ;;  %v1171_v27 = vpop.permute.xlu0 %461  ;;  %v402_v19 = vmul.f32 %v1152_v11, %v1120_v57  ;;  %v403_v20 = vmul.f32 %v1154_v12, %v1120_v57 }
  0xa7   :  { %851 = vset.pattern.permute.xlu1 %v881_v13  ;;  %v515_v57 = vrot.slane %v1138_v1, %v514_v54 }
  0xa8   :  { %v1178_v32 = vadd.f32 %v386_v21, %v272_v24  ;;  %v1180_v33 = vadd.f32 %v387_v22, %v273_v25  ;;  %497 = vperm.xlu1 %851, %v965_v9   ;;  %v395_v9 = vmul.f32 %v1154_v12, %v1107_v51  ;;  %v180_v24 = vmul.f32 %v1161_v16, %v1128_v61 }
  0xa9   :  { %v214_v34 = vpop.permute.xlu1 %213  ;;  %v181_v25 = vmul.f32 %v1163_v17, %v1128_v61  ;;  %v637_v61 = vld [vmem:[%s1453_s3 + $0x78] sm:$0xff] }
  0xaa   :  { %v276_v35 = vadd.f32 %v214_v34, %v164_v28  ;;  %v277_v36 = vadd.f32 %v214_v34, %v165_v29  ;;  %v1183_v37 = vpop.permute.xlu0 %469  ;;  %v406_v34 = vmul.f32 %v1152_v11, %v1130_v62 }
  0xac   :  { %v1187_v13 = vadd.f32 %v390_v30, %v276_v35  ;;  %v1189_v40 = vadd.f32 %v391_v31, %v277_v36  ;;  %501 = vperm.xlu1 %851, %v1031_v26   ;;  %v173_v26 = vmul.f32 %v1163_v17, %v1113_v53  ;;  %v634_v53 = vld [vmem:[%s1453_s3 + $0x60] sm:$0xff]  ;;  %v511_v30 = vrot.slane %v1138_v1, %v510_v8 }
  0xad   :  { %v224_v41 = vpop.permute.xlu1 %223  ;;  %v407_v35 = vmul.f32 %v1154_v12, %v1130_v62  ;;  %v185_v1 = vmul.f32 %v1163_v17, %v1145_v6  ;;  %v1261_v62 = vrot.slane %v515_v57, %v510_v8  ;;  %v158_v57 = vmul.f32 %v1161_v16, %v1091_v42 }
  0xae   :  { %v280_v45 = vadd.f32 %v224_v41, %v168_v38  ;;  %v281_v46 = vadd.f32 %v224_v41, %v169_v39  ;;  %v184_v41 = vmul.f32 %v1161_v16, %v1145_v6 }
  0xaf   :  { %v1199_v48 = vpop.permute.xlu0 %57 }
  0xb0   :  { %v1205_v50 = vadd.f32 %v394_v44, %v280_v45  ;;  %v1207_v52 = vadd.f32 %v395_v9, %v281_v46  ;;  %853 = vset.pattern.permute.xlu1 %v880_v3  ;;  %v177_v3 = vmul.f32 %v1163_v17, %v1117_v56  ;;  %v635_v56 = vld [vmem:[%s1453_s3 + $0x68] sm:$0xff]  ;;  %v1259_v45 = vrot.slane %v511_v30, %v510_v8 }
  0xb1   :  { %v234_v51 = vpop.permute.xlu1 %233  ;;  %695 = vperm.xlu1 %853, %v633_v47   ;;  %v410_v47 = vmul.f32 %v1152_v11, %v1147_v7 }
  0xb2   :  { %v284_v63 = vadd.f32 %v234_v51, %v172_v49  ;;  %v285_v0 = vadd.f32 %v234_v51, %v173_v26  ;;  %v411_v49 = vmul.f32 %v1154_v12, %v1147_v7 }
  0xb3   :  { %v63_v2 = vpop.permute.xlu0 %62 }
  0xb4   :  { %v1221_v5 = vadd.f32 %v398_v59, %v284_v63  ;;  %v1223_v10 = vadd.f32 %v399_v60, %v285_v0  ;;  %v156_v6 = vmul.f32 %v1161_v16, %v63_v2  ;;  %v157_v59 = vmul.f32 %v1163_v17, %v63_v2 }
  0xb5   :  { %v244_v14 = vpop.permute.xlu1 %243  ;;  %700 = vperm.xlu1 %853, %v634_v53   ;;  %v528_v53 = vmul.f32 %v1259_v45, %v1165_v18 }
  0xb6   :  { %v288_v21 = vadd.f32 %v244_v14, %v176_v4  ;;  %v289_v22 = vadd.f32 %v244_v14, %v177_v3  ;;  %v529_v4 = vmul.f32 %v1261_v62, %v1165_v18  ;;  %v268_v7 = vadd.f32 %v1159_v15, %v156_v6 }
  0xb7   :  { %v78_v23 = vpop.permute.xlu0 %77  ;;  %v269_v8 = vadd.f32 %v1159_v15, %v157_v59 }
  0xb8   :  { %v1238_v28 = vadd.f32 %v402_v19, %v288_v21  ;;  %v1240_v29 = vadd.f32 %v403_v20, %v289_v22 }
  0xb9   :  { %v254_v31 = vpop.permute.xlu1 %253  ;;  %705 = vperm.xlu1 %853, %v635_v56  }
  0xba   :  { %v292_v36 = vadd.f32 %v254_v31, %v180_v24  ;;  %v293_v38 = vadd.f32 %v254_v31, %v181_v25  ;;  %v159_v31 = vmul.f32 %v1163_v17, %v1091_v42 }
  0xbb   :  { %v88_v39 = vpop.permute.xlu0 %87 }
  0xbc   :  { %v1255_v44 = vadd.f32 %v406_v34, %v292_v36  ;;  %v1257_v9 = vadd.f32 %v407_v35, %v293_v38  ;;  %v162_v35 = vmul.f32 %v1161_v16, %v78_v23  ;;  %v163_v36 = vmul.f32 %v1163_v17, %v78_v23 }
  0xbd   :  { %v264_v46 = vpop.permute.xlu1 %263  ;;  %715 = vperm.xlu1 %853, %v637_v61   ;;  %v167_v42 = vmul.f32 %v1163_v17, %v88_v39 }
  0xbe   :  { %v296_v26 = vadd.f32 %v264_v46, %v184_v41  ;;  %v297_v51 = vadd.f32 %v264_v46, %v185_v1 }
  0xbf   :  { %v1269_v60 = vpop.permute.xlu0 %97 }
  0xc0   :  { %v1271_v63 = vadd.f32 %v410_v47, %v296_v26  ;;  %v1273_v0 = vadd.f32 %v411_v49, %v297_v51  ;;  %v166_v51 = vmul.f32 %v1161_v16, %v88_v39 }
  0xc2   :  { %v304_v3 = vpop.permute.xlu1 %303 }
  0xc3   :  { %v382_v54 = vmul.f32 %v1152_v11, %v304_v3  ;;  %v383_v2 = vmul.f32 %v1154_v12, %v304_v3  ;;  %v1283_v14 = vpop.permute.xlu0 %107  ;;  %v534_v3 = vmul.f32 %v1259_v45, %v1171_v27 }
  0xc5   :  { %v414_v19 = vadd.f32 %v382_v54, %v268_v7  ;;  %v415_v20 = vadd.f32 %v383_v2, %v269_v8  ;;  %v535_v7 = vmul.f32 %v1261_v62, %v1171_v27  ;;  %v539_v27 = vmul.f32 %v1261_v62, %v1183_v37 }
  0xc6   :  { %v308_v21 = vpop.permute.xlu1 %307 }
  0xc7   :  { %v1285_v22 = vpop.permute.xlu0 %117  ;;  %v1287_v56 = vadd.f32 %v528_v53, %v414_v19  ;;  %v1289_v24 = vadd.f32 %v529_v4, %v415_v20  ;;  %v384_v61 = vmul.f32 %v1152_v11, %v308_v21  ;;  %v385_v41 = vmul.f32 %v1154_v12, %v308_v21 }
  0xca   :  { %v316_v18 = vpop.permute.xlu1 %315 }
  0xcb   :  { %v1291_v25 = vpop.permute.xlu0 %127  ;;  %v388_v59 = vmul.f32 %v1152_v11, %v316_v18  ;;  %v389_v23 = vmul.f32 %v1154_v12, %v316_v18 }
  0xce   :  { %v324_v30 = vpop.permute.xlu1 %323 }
  0xcf   :  { %v189_v15 = vpop.permute.xlu0 %188  ;;  %v392_v19 = vmul.f32 %v1152_v11, %v324_v30  ;;  %v393_v39 = vmul.f32 %v1154_v12, %v324_v30 }
  0xd2   :  { %v1297_v34 = vpop.permute.xlu1 %331 }
  0xd3   :  { %v199_v38 = vpop.permute.xlu0 %198 }
  0xd4   :  { %v270_v1 = vadd.f32 %v199_v38, %v158_v57  ;;  %v271_v46 = vadd.f32 %v199_v38, %v159_v31 }
  0xd6   :  { %v416_v47 = vadd.f32 %v384_v61, %v270_v1  ;;  %v417_v49 = vadd.f32 %v385_v41, %v271_v46  ;;  %v1303_v26 = vpop.permute.xlu1 %339  ;;  %v154_v46 = vmul.f32 %v1161_v16, %v1199_v48 }
  0xd7   :  { %v209_v6 = vpop.permute.xlu0 %208 }
  0xd8   :  { %v274_v53 = vadd.f32 %v209_v6, %v162_v35  ;;  %v275_v4 = vadd.f32 %v209_v6, %v163_v36  ;;  %v538_v35 = vmul.f32 %v1259_v45, %v1183_v37  ;;  %v266_v37 = vadd.f32 %v189_v15, %v154_v46 }
  0xda   :  { %v420_v8 = vadd.f32 %v388_v59, %v274_v53  ;;  %v421_v54 = vadd.f32 %v389_v23, %v275_v4  ;;  %v1313_v2 = vpop.permute.xlu1 %347  ;;  %v380_v23 = vmul.f32 %v1152_v11, %v1094_v43  ;;  %v381_v53 = vmul.f32 %v1154_v12, %v1094_v43 }
  0xdb   :  { %v219_v20 = vpop.permute.xlu0 %218 }
  0xdc   :  { %v278_v21 = vadd.f32 %v219_v20, %v166_v51  ;;  %v279_v57 = vadd.f32 %v219_v20, %v167_v42  ;;  %v1317_v18 = vadd.f32 %v534_v3, %v420_v8  ;;  %v1319_v31 = vadd.f32 %v535_v7, %v421_v54 }
  0xdd   :  { %v155_v51 = vmul.f32 %v1163_v17, %v1199_v48  ;;  %v412_v54 = vadd.f32 %v380_v23, %v266_v37 }
  0xde   :  { %v424_v36 = vadd.f32 %v392_v19, %v278_v21  ;;  %v425_v38 = vadd.f32 %v393_v39, %v279_v57  ;;  %v1325_v61 = vpop.permute.xlu1 %355  ;;  %v593_v57 = vmax.f32 %v1289_v24, 0.0 }
  0xdf   :  { %v1327_v41 = vpop.permute.xlu0 %228  ;;  %v267_v59 = vadd.f32 %v189_v15, %v155_v51  ;;  %v592_v15 = vmax.f32 %v1287_v56, 0.0 }
  0xe0   :  { %v1329_v30 = vadd.f32 %v538_v35, %v424_v36  ;;  %v1331_v1 = vadd.f32 %v539_v27, %v425_v38 }
  0xe1   :  { %v413_v48 = vadd.f32 %v381_v53, %v267_v59 }
  0xe3   :  { %v446_v42 = vpop.permute.xlu1 %445  ;;  %v1337_v6 = vpop.permute.xlu0 %238 }
  0xe4   :  { %v526_v4 = vmul.f32 %v1259_v45, %v446_v42  ;;  %v527_v3 = vmul.f32 %v1261_v62, %v446_v42 }
  0xe6   :  { %v558_v19 = vadd.f32 %v526_v4, %v412_v54  ;;  %v559_v39 = vadd.f32 %v527_v3, %v413_v48 }
  0xe7   :  { %v454_v7 = vpop.permute.xlu1 %453  ;;  %v1345_v8 = vpop.permute.xlu0 %248 }
  0xe8   :  { %v590_v43 = vmax.f32 %v558_v19, 0.0  ;;  %v591_v27 = vmax.f32 %v559_v39, 0.0  ;;  %v530_v51 = vmul.f32 %v1259_v45, %v454_v7  ;;  %v531_v42 = vmul.f32 %v1261_v62, %v454_v7 }
  0xea   :  { %v562_v4 = vadd.f32 %v530_v51, %v416_v47  ;;  %v563_v3 = vadd.f32 %v531_v42, %v417_v49 }
  0xeb   :  { %v458_v20 = vpop.permute.xlu1 %457  ;;  %v1347_v21 = vpop.permute.xlu0 %258 }
  0xec   :  { %v532_v56 = vmul.f32 %v1259_v45, %v458_v20  ;;  %v533_v24 = vmul.f32 %v1261_v62, %v458_v20  ;;  %v594_v39 = vmax.f32 %v562_v4, 0.0  ;;  %v599_v20 = vmax.f32 %v1319_v31, 0.0 }
  0xee   :  { %v564_v48 = vadd.f32 %v532_v56, %v1178_v32  ;;  %v565_v19 = vadd.f32 %v533_v24, %v1180_v33 }
  0xef   :  { %v646_v35 = vpop.permute.xlu0 %645 }
  0xf0   :  { %v720_v36 = vmul.f32 %v646_v35, %v592_v15  ;;  %v721_v38 = vmul.f32 %v646_v35, %v593_v57  ;;  %v641_v46 = vpop.permute.xlu1 %640  ;;  %v595_v15 = vmax.f32 %v563_v3, 0.0 }
  0xf1   :  { %v718_v37 = vmul.f32 %v641_v46, %v590_v43  ;;  %v719_v59 = vmul.f32 %v641_v46, %v591_v27  ;;  %v598_v46 = vmax.f32 %v1317_v18, 0.0 }
  0xf3   :  { %v750_v23 = vadd.f32 %v720_v36, %v718_v37  ;;  %v771_v53 = vadd.f32 %v721_v38, %v719_v59  ;;  %v596_v36 = vmax.f32 %v564_v48, 0.0  ;;  %v597_v38 = vmax.f32 %v565_v19, 0.0  ;;  %v661_v47 = vpop.permute.xlu0 %660 }
  0xf4   :  { %v726_v32 = vmul.f32 %v661_v47, %v598_v46  ;;  %v727_v37 = vmul.f32 %v661_v47, %v599_v20  ;;  %v170_v20 = vmul.f32 %v1161_v16, %v1269_v60 }
  0xf5   :  { %v466_v54 = vpop.permute.xlu1 %465 }
  0xf6   :  { %v536_v4 = vmul.f32 %v1259_v45, %v466_v54  ;;  %v537_v3 = vmul.f32 %v1261_v62, %v466_v54 }
  0xf8   :  { %v568_v24 = vadd.f32 %v536_v4, %v1187_v13  ;;  %v569_v48 = vadd.f32 %v537_v3, %v1189_v40  ;;  %v603_v13 = vmax.f32 %v1331_v1, 0.0  ;;  %v174_v4 = vmul.f32 %v1161_v16, %v1283_v14 }
  0xf9   :  { %v175_v3 = vmul.f32 %v1163_v17, %v1283_v14 }
  0xfa   :  { %v651_v57 = vpop.permute.xlu1 %650 }
  0xfb   :  { %v722_v35 = vmul.f32 %v651_v57, %v594_v39  ;;  %v723_v7 = vmul.f32 %v651_v57, %v595_v15  ;;  %v676_v39 = vpop.permute.xlu0 %675  ;;  %v287_v14 = vadd.f32 %v1337_v6, %v175_v3 }
  0xfd   :  { %v751_v43 = vadd.f32 %v750_v23, %v722_v35  ;;  %v772_v27 = vadd.f32 %v771_v53, %v723_v7  ;;  %v600_v35 = vmax.f32 %v568_v24, 0.0  ;;  %v601_v7 = vmax.f32 %v569_v48, 0.0 }
  0xfe   :  { %v656_v49 = vpop.permute.xlu1 %655 }
  0xff   :  { %v724_v51 = vmul.f32 %v656_v49, %v596_v36  ;;  %v725_v42 = vmul.f32 %v656_v49, %v597_v38  ;;  %v602_v36 = vmax.f32 %v1329_v30, 0.0  ;;  %v691_v40 = vpop.permute.xlu0 %690 }
 0x101   :  { %v752_v33 = vadd.f32 %v751_v43, %v724_v51  ;;  %v773_v59 = vadd.f32 %v772_v27, %v725_v42 }
 0x103   :  { %v474_v23 = vpop.permute.xlu1 %473  ;;  %v753_v53 = vadd.f32 %v752_v33, %v726_v32  ;;  %v774_v56 = vadd.f32 %v773_v59, %v727_v37  ;;  %v282_v32 = vadd.f32 %v1327_v41, %v170_v20 }
 0x104   :  { %v540_v18 = vmul.f32 %v1259_v45, %v474_v23  ;;  %v541_v31 = vmul.f32 %v1261_v62, %v474_v23  ;;  %v397_v23 = vmul.f32 %v1154_v12, %v1297_v34 }
 0x106   :  { %v572_v15 = vadd.f32 %v540_v18, %v1205_v50  ;;  %v573_v57 = vadd.f32 %v541_v31, %v1207_v52  ;;  %v171_v50 = vmul.f32 %v1163_v17, %v1269_v60  ;;  %v396_v60 = vmul.f32 %v1152_v11, %v1297_v34 }
 0x107   :  { %v478_v19 = vpop.permute.xlu1 %477  ;;  %v401_v34 = vmul.f32 %v1154_v12, %v1303_v26 }
 0x108   :  { %v604_v38 = vmax.f32 %v572_v15, 0.0  ;;  %v605_v47 = vmax.f32 %v573_v57, 0.0  ;;  %v283_v30 = vadd.f32 %v1327_v41, %v171_v50  ;;  %v543_v41 = vmul.f32 %v1261_v62, %v478_v19 }
 0x109   :  { %v428_v31 = vadd.f32 %v396_v60, %v282_v32  ;;  %v286_v15 = vadd.f32 %v1337_v6, %v174_v4  ;;  %v400_v57 = vmul.f32 %v1152_v11, %v1303_v26 }
 0x10a   :  { %v732_v37 = vmul.f32 %v676_v39, %v604_v38  ;;  %v733_v1 = vmul.f32 %v676_v39, %v605_v47  ;;  %v429_v39 = vadd.f32 %v397_v23, %v283_v30  ;;  %v433_v38 = vadd.f32 %v401_v34, %v287_v14 }
 0x10b   :  { %v182_v14 = vmul.f32 %v1161_v16, %v1291_v25  ;;  %v405_v34 = vmul.f32 %v1154_v12, %v1313_v2 }
 0x10c   :  { %v666_v54 = vpop.permute.xlu1 %665 }
 0x10d   :  { %v728_v43 = vmul.f32 %v666_v54, %v600_v35  ;;  %v729_v27 = vmul.f32 %v666_v54, %v601_v7  ;;  %v575_v54 = vadd.f32 %v543_v41, %v429_v39 }
 0x10f   :  { %v754_v49 = vadd.f32 %v753_v53, %v728_v43  ;;  %v775_v46 = vadd.f32 %v774_v56, %v729_v27  ;;  %v482_v53 = vpop.permute.xlu0 %481  ;;  %v542_v56 = vmul.f32 %v1259_v45, %v478_v19  ;;  %v607_v20 = vmax.f32 %v575_v54, 0.0 }
 0x110   :  { %v671_v52 = vpop.permute.xlu1 %670  ;;  %v544_v35 = vmul.f32 %v1259_v45, %v482_v53  ;;  %v545_v7 = vmul.f32 %v1261_v62, %v482_v53  ;;  %v178_v53 = vmul.f32 %v1161_v16, %v1285_v22 }
 0x111   :  { %v730_v51 = vmul.f32 %v671_v52, %v602_v36  ;;  %v731_v42 = vmul.f32 %v671_v52, %v603_v13  ;;  %v574_v19 = vadd.f32 %v542_v56, %v428_v31  ;;  %v432_v13 = vadd.f32 %v400_v57, %v286_v15 }
 0x112   :  { %v576_v6 = vadd.f32 %v544_v35, %v1221_v5  ;;  %v577_v47 = vadd.f32 %v545_v7, %v1223_v10  ;;  %v179_v56 = vmul.f32 %v1163_v17, %v1285_v22  ;;  %v290_v15 = vadd.f32 %v1345_v8, %v178_v53 }
 0x113   :  { %v755_v33 = vadd.f32 %v754_v49, %v730_v51  ;;  %v776_v59 = vadd.f32 %v775_v46, %v731_v42  ;;  %v606_v26 = vmax.f32 %v574_v19, 0.0  ;;  %v494_v41 = vpop.permute.xlu0 %493  ;;  %v183_v57 = vmul.f32 %v1163_v17, %v1291_v25 }
 0x114   :  { %v608_v42 = vmax.f32 %v576_v6, 0.0  ;;  %v609_v32 = vmax.f32 %v577_v47, 0.0  ;;  %v404_v22 = vmul.f32 %v1152_v11, %v1313_v2  ;;  %v550_v35 = vmul.f32 %v1259_v45, %v494_v41 }
 0x115   :  { %v486_v24 = vpop.permute.xlu1 %485  ;;  %v756_v48 = vadd.f32 %v755_v33, %v732_v37  ;;  %v777_v18 = vadd.f32 %v776_v59, %v733_v1  ;;  %v551_v7 = vmul.f32 %v1261_v62, %v494_v41  ;;  %v295_v17 = vadd.f32 %v1347_v21, %v183_v57 }
 0x116   :  { %v546_v43 = vmul.f32 %v1259_v45, %v486_v24  ;;  %v547_v27 = vmul.f32 %v1261_v62, %v486_v24  ;;  %v408_v25 = vmul.f32 %v1152_v11, %v1325_v61  ;;  %v409_v2 = vmul.f32 %v1154_v12, %v1325_v61 }
 0x118   :  { %v578_v49 = vadd.f32 %v546_v43, %v432_v13  ;;  %v579_v46 = vadd.f32 %v547_v27, %v433_v38  ;;  %v436_v43 = vadd.f32 %v404_v22, %v290_v15  ;;  %v294_v27 = vadd.f32 %v1347_v21, %v182_v14  ;;  %v506_v38 = vpop.permute.xlu0 %505 }
 0x119   :  { %v490_v36 = vpop.permute.xlu1 %489  ;;  %v556_v11 = vmul.f32 %v1259_v45, %v506_v38  ;;  %v557_v12 = vmul.f32 %v1261_v62, %v506_v38 }
 0x11a   :  { %v610_v30 = vmax.f32 %v578_v49, 0.0  ;;  %v611_v37 = vmax.f32 %v579_v46, 0.0  ;;  %v548_v24 = vmul.f32 %v1259_v45, %v490_v36  ;;  %v549_v31 = vmul.f32 %v1261_v62, %v490_v36 }
 0x11b   :  { %v582_v36 = vadd.f32 %v550_v35, %v436_v43  ;;  %v440_v21 = vadd.f32 %v408_v25, %v294_v27  ;;  %v882_v27 = vmov 1966171168  }
 0x11c   :  { %v738_v60 = vmul.f32 %v691_v40, %v610_v30  ;;  %v739_v5 = vmul.f32 %v691_v40, %v611_v37  ;;  %v291_v40 = vadd.f32 %v1345_v8, %v179_v56  ;;  %v580_v19 = vadd.f32 %v548_v24, %v1238_v28 }
 0x11d   :  { %v581_v8 = vadd.f32 %v549_v31, %v1240_v29 }
 0x11e   :  { %v681_v50 = vpop.permute.xlu1 %680  ;;  %v437_v16 = vadd.f32 %v405_v34, %v291_v40  ;;  %v612_v49 = vmax.f32 %v580_v19, 0.0 }
 0x11f   :  { %v734_v52 = vmul.f32 %v681_v50, %v606_v26  ;;  %v735_v51 = vmul.f32 %v681_v50, %v607_v20  ;;  %v613_v46 = vmax.f32 %v581_v8, 0.0  ;;  %v441_v26 = vadd.f32 %v409_v2, %v295_v17 }
 0x120   :  { %v583_v13 = vadd.f32 %v551_v7, %v437_v16  ;;  %v800_v17 = vunpack.c.l.s4 %v882_v27 }
 0x121   :  { %v757_v1 = vadd.f32 %v756_v48, %v734_v52  ;;  %v778_v33 = vadd.f32 %v777_v18, %v735_v51 }
 0x122   :  { %v686_v59 = vpop.permute.xlu1 %685  ;;  %v801_v38 = vunpack.c.0.s8 %v800_v17 }
 0x123   :  { %v736_v4 = vmul.f32 %v686_v59, %v608_v42  ;;  %v737_v3 = vmul.f32 %v686_v59, %v609_v32  ;;  %v614_v42 = vmax.f32 %v582_v36, 0.0  ;;  %v615_v32 = vmax.f32 %v583_v13, 0.0 }
 0x125   :  { %v758_v23 = vadd.f32 %v757_v1, %v736_v4  ;;  %v779_v10 = vadd.f32 %v778_v33, %v737_v3 }
 0x127   :  { %v498_v48 = vpop.permute.xlu1 %497  ;;  %v759_v18 = vadd.f32 %v758_v23, %v738_v60  ;;  %v780_v39 = vadd.f32 %v779_v10, %v739_v5 }
 0x128   :  { %v552_v28 = vmul.f32 %v1259_v45, %v498_v48  ;;  %v553_v29 = vmul.f32 %v1261_v62, %v498_v48 }
 0x12a   :  { %v584_v52 = vadd.f32 %v552_v28, %v1255_v44  ;;  %v585_v51 = vadd.f32 %v553_v29, %v1257_v9  ;;  %v711_v9 = vpop.permute.xlu0 %710  ;;  %v793_v28 = vstv %s1454_s4 }
 0x12b   :  { %v502_v54 = vpop.permute.xlu1 %501 }
 0x12c   :  { %v554_v6 = vmul.f32 %v1259_v45, %v502_v54  ;;  %v555_v47 = vmul.f32 %v1261_v62, %v502_v54  ;;  %v616_v60 = vmax.f32 %v584_v52, 0.0  ;;  %v617_v5 = vmax.f32 %v585_v51, 0.0 }
 0x12d   :  { %v588_v45 = vadd.f32 %v556_v11, %v1271_v63  ;;  %v589_v62 = vadd.f32 %v557_v12, %v1273_v0 }
 0x12e   :  { %v586_v1 = vadd.f32 %v554_v6, %v440_v21  ;;  %v587_v33 = vadd.f32 %v555_v47, %v441_v26 }
 0x12f   :  { %v620_v31 = vmax.f32 %v588_v45, 0.0  ;;  %v621_v48 = vmax.f32 %v589_v62, 0.0 }
 0x130   :  { %v696_v20 = vpop.permute.xlu1 %695  ;;  %v618_v23 = vmax.f32 %v586_v1, 0.0  ;;  %v619_v10 = vmax.f32 %v587_v33, 0.0 }
 0x131   :  { %v740_v61 = vmul.f32 %v696_v20, %v612_v49  ;;  %v741_v50 = vmul.f32 %v696_v20, %v613_v46  ;;  %v804_v46 = vsub.s32 %v801_v38, %v1123_v58 }
 0x133   :  { %v760_v30 = vadd.f32 %v759_v18, %v740_v61  ;;  %v781_v37 = vadd.f32 %v780_v39, %v741_v50  ;;  %v746_v18 = vmul.f32 %v711_v9, %v618_v23  ;;  %v747_v39 = vmul.f32 %v711_v9, %v619_v10 }
 0x134   :  { %v701_v59 = vpop.permute.xlu1 %700 }
 0x135   :  { %v742_v4 = vmul.f32 %v701_v59, %v614_v42  ;;  %v743_v3 = vmul.f32 %v701_v59, %v615_v32 }
 0x137   :  { %v761_v44 = vadd.f32 %v760_v30, %v742_v4  ;;  %v782_v53 = vadd.f32 %v781_v37, %v743_v3 }
 0x138   :  { %v706_v56 = vpop.permute.xlu1 %705 }
 0x139   :  { %v744_v41 = vmul.f32 %v706_v56, %v616_v60  ;;  %v745_v24 = vmul.f32 %v706_v56, %v617_v5 }
 0x13b   :  { %v762_v15 = vadd.f32 %v761_v44, %v744_v41  ;;  %v783_v40 = vadd.f32 %v782_v53, %v745_v24 }
 0x13c   :  { %v716_v14 = vpop.permute.xlu1 %715 }
 0x13d   :  { %v748_v57 = vmul.f32 %v716_v14, %v620_v31  ;;  %v749_v22 = vmul.f32 %v716_v14, %v621_v48  ;;  %v763_v63 = vadd.f32 %v762_v15, %v746_v18  ;;  %v784_v34 = vadd.f32 %v783_v40, %v747_v39 }
 0x13f   :  { %v764_v0 = vadd.f32 %v763_v63, %v748_v57  ;;  %v785_v35 = vadd.f32 %v784_v34, %v749_v22 }
 0x141   :  { %v765_v7 = vrot.slane %v764_v0, 4  ;;  %v786_v19 = vrot.slane %v785_v35, 4 }
 0x143   :  { %v766_v8 = vadd.f32 %v765_v7, %v764_v0  ;;  %v787_v54 = vadd.f32 %v786_v19, %v785_v35 }
 0x145   :  { %v767_v43 = vrot.slane %v766_v8, 2  ;;  %v788_v16 = vrot.slane %v787_v54, 2 }
 0x147   :  { %v768_v25 = vadd.f32 %v767_v43, %v766_v8  ;;  %v789_v2 = vadd.f32 %v788_v16, %v787_v54 }
 0x149   :  { %v769_v36 = vrot.slane %v768_v25, 1  ;;  %v790_v13 = vrot.slane %v789_v2, 1 }
 0x14b   :  { %v770_v29 = vadd.f32 %v769_v36, %v768_v25  ;;  %v791_v6 = vadd.f32 %v790_v13, %v789_v2 }
 0x14d   :  { %v794_v47 = vadd.f32 %v793_v28, %v770_v29  ;;  %v795_v49 = vadd.f32 %v793_v28, %v791_v6 }
 0x14f   :  { %v798_v21 = vcombine.low %v794_v47, %v795_v49 }
 0x151   :  { %v805_v26 = vrot.slane %v798_v21, %v804_v46 }
 0x153   :  { %v812_v20 = vrot.slane %v805_v26, %v804_v46 }
 0x155   :  { %818 = vst.msk [vmem:[#allocation3] sm:$0x3] %vm816_vm0, %v812_v20 }
 0x156   :  { %866 = shalt.err (!%p863_p4)
}
 0x157   :  { %s867_s16 = scalar_lea.hbm %s1455_s5, 32 }
 0x158   :  { %p868_p5 = scmp.ne.s32.totalorder %s1455_s5, %s867_s16  ;;  %p871_p6 = scmp.lt.u32.totalorder %s867_s16, %s1455_s5 }
 0x15a   :  { %p873_p7 = pnand %p871_p6, %p868_p5 }
 0x15c   :  { %876 = shalt.err (!%p873_p7)
}
 0x15d   :  { %828 = dma.vmem_to_hbm [thread:$0]  %s826_s13, 32, %s1455_s5, [#allocation4]  }
 0x15e   :  { %877 = dma.done.wait [#allocation4], 32  }
 0x15f   :  { %878 = vsyncadd [#allocation4], 4294967264 }
 0x160   :  { %832 = vsyncpa [#allocation4], 1 }

</bundles_post_ra>
